<compile_context>
chip_gen: v6e
topology: v6e:2x2x1
jax: 0.10.0
libtpu: 0.0.40
codegen_flags: <defaults>
</compile_context>

<pallas_src>
import jax
import jax.numpy as jnp
from jax.experimental import pallas as pl
from jax.experimental.pallas import tpu as pltpu

_LANE = 128          # pad the 10-wide output to a lane-dense 128 columns
_TB_MAX = 1024       # max batch-tile rows (f32 x: ~10 MiB peak VMEM incl. double buffers)
_D_IN = 1024
_HID = 512
_N_OUT = 10


def _round_up(n, m):
    return ((n + m - 1) // m) * m


def mlp_kernel(x_ref, w1_ref, b1_ref, w2_ref, b2_ref, o_ref):
    # x arrives as f32; cast to bf16 on the VPU (hidden under DMA/MXU) so both
    # matmuls run as bf16 MXU ops with f32 accumulation.
    x = x_ref[...].astype(jnp.bfloat16)
    h = jnp.dot(x, w1_ref[...], preferred_element_type=jnp.float32)
    h = jnp.maximum(h + b1_ref[...], 0.0)                       # (TB, 512) + (1, 512)
    out = jnp.dot(h.astype(jnp.bfloat16), w2_ref[...],
                  preferred_element_type=jnp.float32)
    o_ref[...] = (out + b2_ref[...]).astype(o_ref.dtype)        # (TB, 128) + (1, 128)


def prepare_params(w1, b1, w2, b2):
    """One-time conversion of params into kernel-ready tensors.  Call once, reuse.

    w1: [1024, 512]  ([in, out], i.e. transposed vs. nn.Linear's [out, in])
    b1: [512]
    w2: [512, 10]
    b2: [10]
    """
    n_pad = _round_up(_N_OUT, _LANE)
    w1_bf = w1.astype(jnp.bfloat16)
    w2_bf = jnp.pad(w2, ((0, 0), (0, n_pad - _N_OUT))).astype(jnp.bfloat16)
    b1_row = b1.reshape(1, _HID).astype(jnp.float32)
    b2_row = jnp.pad(b2.reshape(1, _N_OUT),
                     ((0, 0), (0, n_pad - _N_OUT))).astype(jnp.float32)
    return w1_bf, b1_row, w2_bf, b2_row


@jax.jit
def simple_network(x, w1_bf, b1_row, w2_bf, b2_row):
    """Forward pass: relu(x @ W1 + b1) @ W2 + b2.   x: [B, 1024] f32 -> [B, 10] f32."""
    B, d_in = x.shape
    assert d_in == _D_IN
    n_pad = w2_bf.shape[1]

    # Batch tiling: >=2 grid steps whenever the batch allows it (feeds both v7x
    # TensorCores via the "parallel" axis); tiles capped at _TB_MAX rows and
    # rounded to the 8-row sublane granule.
    B8 = _round_up(B, 8)
    TB = min(_TB_MAX, _round_up(max(8, B8 // 2), 8))
    B_pad = _round_up(B8, TB)

    x_in = jnp.pad(x, ((0, B_pad - B), (0, 0))) if B_pad != B else x

    grid = (B_pad // TB,)

    flops = 2 * B_pad * (_D_IN * _HID + _HID * n_pad)
    bytes_accessed = (x_in.size * 4 + w1_bf.size * 2 + w2_bf.size * 2
                      + b1_row.size * 4 + b2_row.size * 4 + B_pad * n_pad * 4)

    out_pad = pl.pallas_call(
        mlp_kernel,
        out_shape=jax.ShapeDtypeStruct((B_pad, n_pad), jnp.float32),
        grid=grid,
        in_specs=[
            pl.BlockSpec((TB, _D_IN), lambda i: (i, 0)),     # x tile: pipelined (f32)
            pl.BlockSpec((_D_IN, _HID), lambda i: (0, 0)),   # W1: resident (bf16)
            pl.BlockSpec((1, _HID), lambda i: (0, 0)),       # b1: resident (f32)
            pl.BlockSpec((_HID, n_pad), lambda i: (0, 0)),   # W2: resident (bf16, padded)
            pl.BlockSpec((1, n_pad), lambda i: (0, 0)),      # b2: resident (f32, padded)
        ],
        out_specs=pl.BlockSpec((TB, n_pad), lambda i: (i, 0)),
        compiler_params=pltpu.CompilerParams(
            dimension_semantics=("parallel",),
            vmem_limit_bytes=32 * 1024 * 1024,
        ),
        cost_estimate=pl.CostEstimate(
            flops=flops, transcendentals=0, bytes_accessed=bytes_accessed),
    )(x_in, w1_bf, b1_row, w2_bf, b2_row)

    return out_pad[:B, :_N_OUT]


def init_params(key):
    """Deterministic init mimicking PyTorch nn.Linear defaults (uniform +-1/sqrt(fan_in))."""
    k1, k2, k3, k4 = jax.random.split(key, 4)
    bound1 = 1.0 / jnp.sqrt(jnp.float32(_D_IN))
    bound2 = 1.0 / jnp.sqrt(jnp.float32(_HID))
    # Stored directly as [in, out] (transposed relative to PyTorch's [out, in]).
    w1 = jax.random.uniform(k1, (_D_IN, _HID), jnp.float32, -bound1, bound1)
    b1 = jax.random.uniform(k2, (_HID,), jnp.float32, -bound1, bound1)
    w2 = jax.random.uniform(k3, (_HID, _N_OUT), jnp.float32, -bound2, bound2)
    b2 = jax.random.uniform(k4, (_N_OUT,), jnp.float32, -bound2, bound2)
    return w1, b1, w2, b2


if __name__ == "__main__":
    key = jax.random.PRNGKey(0)
    k_x, k_p = jax.random.split(key)

    B = 8  # small batch
    x = jax.random.normal(k_x, (B, _D_IN), jnp.float32)
    w1, b1, w2, b2 = init_params(k_p)

    # One-time param prep, hoisted out of the per-call path (perf review item 2).
    params = prepare_params(w1, b1, w2, b2)

    out = simple_network(x, *params)
    out = jax.block_until_ready(out)

    # Pure-f32 reference (same math as the PyTorch forward).
    ref = jnp.maximum(x @ w1 + b1[None, :], 0.0) @ w2 + b2[None, :]
    assert out.shape == (B, _N_OUT)
    # bf16 weights/activations on the MXU -> looser tolerance vs the f32 reference.
    max_err = float(jnp.max(jnp.abs(out - ref)))
    assert max_err < 5e-2, f"max abs error {max_err}"

    print("KERNEL_OK")
</pallas_src>

<mosaic_0001>
module attributes {stable_mosaic.version = 11 : i64} {
  func.func @mlp_kernel(%arg0: i32, %arg1: memref<8x1024xf32, #tpu.memory_space<vmem>>, %arg2: memref<1024x512xbf16, #tpu.memory_space<vmem>>, %arg3: memref<1x512xf32, #tpu.memory_space<vmem>>, %arg4: memref<512x128xbf16, #tpu.memory_space<vmem>>, %arg5: memref<1x128xf32, #tpu.memory_space<vmem>>, %arg6: memref<8x128xf32, #tpu.memory_space<vmem>>) attributes {dimension_semantics = [#tpu.dimension_semantics<parallel>], iteration_bounds = array<i64: 1>, scalar_prefetch = 0 : i64, scratch_operands = 0 : i64, tpu.core_type = #tpu.core_type<tc>, window_params = [{transform_indices = @transform_0, window_bounds = array<i64: 8, 1024>}, {pipeline_mode = #tpu.pipeline_mode<synchronous>, transform_indices = @transform_1, window_bounds = array<i64: 1024, 512>}, {pipeline_mode = #tpu.pipeline_mode<synchronous>, transform_indices = @transform_2, window_bounds = array<i64: 1, 512>}, {pipeline_mode = #tpu.pipeline_mode<synchronous>, transform_indices = @transform_3, window_bounds = array<i64: 512, 128>}, {pipeline_mode = #tpu.pipeline_mode<synchronous>, transform_indices = @transform_4, window_bounds = array<i64: 1, 128>}, {transform_indices = @transform_5, window_bounds = array<i64: 8, 128>}]} {
    %c0 = arith.constant 0 : index
    %c0_0 = arith.constant 0 : index
    %0 = vector.load %arg1[%c0, %c0_0] : memref<8x1024xf32, #tpu.memory_space<vmem>>, vector<8x1024xf32>
    %1 = arith.truncf %0 : vector<8x1024xf32> to vector<8x1024xbf16>
    %c0_1 = arith.constant 0 : index
    %c0_2 = arith.constant 0 : index
    %2 = vector.load %arg2[%c0_1, %c0_2] : memref<1024x512xbf16, #tpu.memory_space<vmem>>, vector<1024x512xbf16>
    %cst = arith.constant dense<0.000000e+00> : vector<8x512xf32>
    %3 = tpu.matmul %1, %2, %cst {dimension_numbers = #tpu.dot_dimension_numbers<[1], [0], [0], [1], [0, 0, 1, 1], [], []>} : vector<8x1024xbf16>, vector<1024x512xbf16>, vector<8x512xf32> -> vector<8x512xf32>
    %c0_3 = arith.constant 0 : index
    %c0_4 = arith.constant 0 : index
    %4 = vector.load %arg3[%c0_3, %c0_4] : memref<1x512xf32, #tpu.memory_space<vmem>>, vector<1x512xf32>
    %5 = vector.broadcast %4 : vector<1x512xf32> to vector<8x512xf32>
    %6 = arith.addf %3, %5 : vector<8x512xf32>
    %cst_5 = arith.constant 0.000000e+00 : f32
    %7 = vector.broadcast %cst_5 : f32 to vector<8x512xf32>
    %8 = arith.maximumf %6, %7 : vector<8x512xf32>
    %9 = arith.truncf %8 : vector<8x512xf32> to vector<8x512xbf16>
    %c0_6 = arith.constant 0 : index
    %c0_7 = arith.constant 0 : index
    %10 = vector.load %arg4[%c0_6, %c0_7] : memref<512x128xbf16, #tpu.memory_space<vmem>>, vector<512x128xbf16>
    %cst_8 = arith.constant dense<0.000000e+00> : vector<8x128xf32>
    %11 = tpu.matmul %9, %10, %cst_8 {dimension_numbers = #tpu.dot_dimension_numbers<[1], [0], [0], [1], [0, 0, 1, 1], [], []>} : vector<8x512xbf16>, vector<512x128xbf16>, vector<8x128xf32> -> vector<8x128xf32>
    %c0_9 = arith.constant 0 : index
    %c0_10 = arith.constant 0 : index
    %12 = vector.load %arg5[%c0_9, %c0_10] : memref<1x128xf32, #tpu.memory_space<vmem>>, vector<1x128xf32>
    %13 = vector.broadcast %12 : vector<1x128xf32> to vector<8x128xf32>
    %14 = arith.addf %11, %13 : vector<8x128xf32>
    %c0_11 = arith.constant 0 : index
    %c0_12 = arith.constant 0 : index
    %15 = vector.load %arg6[%c0_11, %c0_12] : memref<8x128xf32, #tpu.memory_space<vmem>>, vector<8x128xf32>
    tpu.vector_store %arg6[%c0_11, %c0_12], %14 {strides = array<i32>} : memref<8x128xf32, #tpu.memory_space<vmem>>, vector<8x128xf32>,
    return
  }
  func.func @transform_0(%arg0: i32) -> (i32, i32) {
    %c0_i32 = arith.constant 0 : i32
    %c0_i32_0 = arith.constant 0 : i32
    return %arg0, %c0_i32 : i32, i32
  }
  func.func @transform_1(%arg0: i32) -> (i32, i32) {
    %c0_i32 = arith.constant 0 : i32
    %c0_i32_0 = arith.constant 0 : i32
    %c0_i32_1 = arith.constant 0 : i32
    return %c0_i32, %c0_i32_0 : i32, i32
  }
  func.func @transform_2(%arg0: i32) -> (i32, i32) {
    %c0_i32 = arith.constant 0 : i32
    %c0_i32_0 = arith.constant 0 : i32
    %c0_i32_1 = arith.constant 0 : i32
    return %c0_i32, %c0_i32_0 : i32, i32
  }
  func.func @transform_3(%arg0: i32) -> (i32, i32) {
    %c0_i32 = arith.constant 0 : i32
    %c0_i32_0 = arith.constant 0 : i32
    %c0_i32_1 = arith.constant 0 : i32
    return %c0_i32, %c0_i32_0 : i32, i32
  }
  func.func @transform_4(%arg0: i32) -> (i32, i32) {
    %c0_i32 = arith.constant 0 : i32
    %c0_i32_0 = arith.constant 0 : i32
    %c0_i32_1 = arith.constant 0 : i32
    return %c0_i32, %c0_i32_0 : i32, i32
  }
  func.func @transform_5(%arg0: i32) -> (i32, i32) {
    %c0_i32 = arith.constant 0 : i32
    %c0_i32_0 = arith.constant 0 : i32
    return %arg0, %c0_i32 : i32, i32
  }
}

</mosaic_0001>

<bundles_post_ra>
// kernel: simple_network.1
= control target key start
LH: loop header
LB: loop body
LE: loop exit
PB: predicated region body
PF: predicated region fallthrough
CT: control target
= control target key end

     0   :  { %10 = vsyncpa [#allocation3], 0  ;;  %s3308_s0 = inlined_call_operand.hbm [shape: f32[8,1024], index: 0, kind: input, shape index: {}]   ;;  %s3309_s1 = inlined_call_operand.hbm [shape: bf16[1024,512], index: 1, kind: input, shape index: {}]   ;;  %s3310_s2 = inlined_call_operand.hbm [shape: f32[1,512], index: 2, kind: input, shape index: {}]   ;;  %s3311_s3 = inlined_call_operand.hbm [shape: bf16[512,128], index: 3, kind: input, shape index: {}]   ;;  %s3312_s4 = inlined_call_operand.vmem [shape: f32[1,128], index: 4, kind: input, shape index: {}]   ;;  %s3313_s5 = inlined_call_operand.hbm [shape: f32[8,128], index: 5, kind: output, shape index: {}]  }
   0x1   :  { %11 = vsyncpa [#allocation6], 0 }
   0x2   :  { %12 = vsyncpa [#allocation9], 0 }
   0x3   :  { %13 = vsyncpa [#allocation4], 0  ;;  %s3210_s18 = smov [#allocation5]  }
   0x4   :  { %s29_s19 = sshll.u32 %s3210_s18, 4  ;;  %s30_s19 = int_to_ptr.vmem [resolvable:$true] %s29_s19 }
   0x5   :  { %s3110_s20 = scalar_lea.vmem %s30_s19, 32768  ;;  %p3115_p1 = scmp.lt.s32.totalorder %s30_s19, %s30_s19 }
   0x6   :  { %p3111_p0 = scmp.ne.s32.totalorder %s30_s19, %s3110_s20  ;;  %p3116_p2 = scmp.lt.s32.totalorder %s3110_s20, %s3110_s20 }
   0x8   :  { %p3117_p3 = por %p3116_p2, %p3115_p1 }
   0xa   :  { %p3118_p4 = pnand %p3117_p3, %p3111_p0 }
   0xc   :  { %3121 = shalt.err (!%p3118_p4)
}
   0xd   :  { %s3211_s21 = smov 256   ;;  %s3212_s22 = smov 16  }
   0xe   :  { %35 = dma.hbm_to_vmem [thread:$0]  %s3309_s1, 32768, %s30_s19, [#allocation6], %s3211_s21, %s3211_s21, %s3212_s22  }
   0xf   :  { %s3213_s25 = smov [#allocation2]   ;;  %s3214_s27 = smov [#allocation7]  }
  0x10   :  { %s20_s26 = sshll.u32 %s3213_s25, 4  ;;  %s42_s28 = sshll.u32 %s3214_s27, 4  ;;  %s21_s26 = int_to_ptr.vmem [resolvable:$true] %s20_s26  ;;  %s43_s28 = int_to_ptr.vmem [resolvable:$true] %s42_s28 }
  0x11   :  { %s3130_s29 = scalar_lea.vmem %s21_s26, 1024  ;;  %p3135_p6 = scmp.lt.s32.totalorder %s21_s26, %s21_s26 }
  0x12   :  { %p3131_p5 = scmp.ne.s32.totalorder %s21_s26, %s3130_s29  ;;  %p3136_p7 = scmp.lt.s32.totalorder %s3130_s29, %s3130_s29 }
  0x14   :  { %p3137_p8 = por %p3136_p7, %p3135_p6 }
  0x16   :  { %p3138_p9 = pnand %p3137_p8, %p3131_p5 }
  0x18   :  { %3141 = shalt.err (!%p3138_p9)
}
  0x19   :  { %23 = dma.hbm_to_vmem [thread:$0]  %s3308_s0, 1024, %s21_s26, [#allocation3]  }
  0x1a   :  { %s3150_s7 = scalar_lea.vmem %s43_s28, 64  ;;  %p3155_p11 = scmp.lt.s32.totalorder %s43_s28, %s43_s28 }
  0x1b   :  { %p3151_p10 = scmp.ne.s32.totalorder %s43_s28, %s3150_s7  ;;  %p3156_p12 = scmp.lt.s32.totalorder %s3150_s7, %s3150_s7 }
  0x1d   :  { %p3157_p13 = por %p3156_p12, %p3155_p11 }
  0x1f   :  { %p3158_p0 = pnand %p3157_p13, %p3151_p10 }
  0x21   :  { %3161 = shalt.err (!%p3158_p0)
}
  0x22   :  { %45 = dma.hbm_to_vmem [thread:$0]  %s3310_s2, 64, %s43_s28, [#allocation6]  }
  0x23   :  { %s3215_s9 = smov [#allocation8]  }
  0x24   :  { %s51_s10 = sshll.u32 %s3215_s9, 4  ;;  %s52_s10 = int_to_ptr.vmem [resolvable:$true] %s51_s10 }
  0x25   :  { %s3170_s11 = scalar_lea.vmem %s52_s10, 4096  ;;  %p3175_p2 = scmp.lt.s32.totalorder %s52_s10, %s52_s10 }
  0x26   :  { %p3171_p1 = scmp.ne.s32.totalorder %s52_s10, %s3170_s11  ;;  %p3176_p3 = scmp.lt.s32.totalorder %s3170_s11, %s3170_s11 }
  0x28   :  { %p3177_p4 = por %p3176_p3, %p3175_p2 }
  0x2a   :  { %p3178_p5 = pnand %p3177_p4, %p3171_p1 }
  0x2c   :  { %3181 = shalt.err (!%p3178_p5)
}
  0x2d   :  { %s3216_s0 = smov 64   ;;  %s3217_s12 = smov 4  }
  0x2e   :  { %57 = dma.hbm_to_vmem [thread:$0]  %s3311_s3, 4096, %s52_s10, [#allocation9], %s3216_s0, %s3216_s0, %s3217_s12  }
  0x2f   :  { %3202 = dma.done.wait [#allocation3], 1024  }
  0x30   :  { %3203 = vsyncadd [#allocation3], 4294966272 }
  0x31   :  { %3204 = dma.done.wait [#allocation6], 32832  }
  0x32   :  { %3205 = vsyncadd [#allocation6], 4294934464 }
  0x33   :  { %3206 = dma.done.wait [#allocation9], 4096  }
  0x34   :  { %3207 = vsyncadd [#allocation9], 4294963200  ;;  %v2686_v0 = vld [vmem:[#allocation5 + $0xe4] ss:$16 sps:$4 sm:$0xff]   ;;  %v2690_v2 = vld [vmem:[#allocation5 + $0xe0] ss:$16 sps:$4 sm:$0xff]  }
  0x35   :  { %v2688_v1 = vld [vmem:[#allocation5 + $0x2e4] ss:$16 sps:$4 sm:$0xff]   ;;  %1647 = vmatprep.subr.bf16.mxu0 %v2686_v0  ;;  %v2691_v3 = vld [vmem:[#allocation5 + $0x2e0] ss:$16 sps:$4 sm:$0xff]   ;;  %v74_v46 = vld [vmem:[#allocation2 + $0x8] sm:$0xff]  ;;  %s3218_s15 = smov [#allocation10]  }
  0x36   :  { %1688 = vmatprep.subr.bf16.mxu1 %v2688_v1  ;;  %v2692_v4 = vld [vmem:[#allocation5 + $0xc4] ss:$16 sps:$4 sm:$0xff]   ;;  %1648 = vmatpush1.bf16.msra.mxu0 %v2690_v2  ;;  %v2696_v6 = vld [vmem:[#allocation5 + $0xc0] ss:$16 sps:$4 sm:$0xff]   ;;  %v3261_v49 = vpack.c.bf16 %v74_v46, %v74_v46  ;;  %v76_v50 = vld [vmem:[#allocation2 + $0x18] sm:$0xff]  ;;  %s2333_s16 = sshll.u32 %s3218_s15, 4  ;;  %s2334_s16 = int_to_ptr.vmem [resolvable:$true] %s2333_s16 }
  0x37   :  { %1689 = vmatpush1.bf16.msra.mxu1 %v2691_v3  ;;  %v2694_v5 = vld [vmem:[#allocation5 + $0x2c4] ss:$16 sps:$4 sm:$0xff]   ;;  %1649 = vmatprep.subr.bf16.mxu0 %v2692_v4  ;;  %v2697_v7 = vld [vmem:[#allocation5 + $0x2c0] ss:$16 sps:$4 sm:$0xff]   ;;  %v3263_v52 = vpack.c.bf16 %v76_v50, %v76_v50  ;;  %s3182_s17 = scalar_lea.vmem %s2334_s16, 128  ;;  %p3187_p7 = scmp.lt.s32.totalorder %s2334_s16, %s2334_s16 }
  0x38   :  { %1690 = vmatprep.subr.bf16.mxu1 %v2694_v5  ;;  %v2698_v8 = vld [vmem:[#allocation5 + $0xa4] ss:$16 sps:$4 sm:$0xff]   ;;  %v2702_v10 = vld [vmem:[#allocation5 + $0xa0] ss:$16 sps:$4 sm:$0xff]   ;;  %1679 = vmatprep.mubr.bf16.mxu0 %v3261_v49  ;;  %p3183_p6 = scmp.ne.s32.totalorder %s2334_s16, %s3182_s17  ;;  %p3188_p8 = scmp.lt.s32.totalorder %s3182_s17, %s3182_s17 }
  0x39   :  { %v2700_v9 = vld [vmem:[#allocation5 + $0x2a4] ss:$16 sps:$4 sm:$0xff]   ;;  %v2703_v11 = vld [vmem:[#allocation5 + $0x2a0] ss:$16 sps:$4 sm:$0xff]   ;;  %1720 = vmatprep.mubr.bf16.mxu1 %v3263_v52 }
  0x3a   :  { %1650 = vmatpush1.bf16.msra.mxu0 %v2696_v6  ;;  %v2704_v12 = vld [vmem:[#allocation5 + $0x84] ss:$16 sps:$4 sm:$0xff]   ;;  %v2708_v14 = vld [vmem:[#allocation5 + $0x80] ss:$16 sps:$4 sm:$0xff]   ;;  %p3189_p9 = por %p3188_p8, %p3187_p7 }
  0x3b   :  { %1691 = vmatpush1.bf16.msra.mxu1 %v2697_v7  ;;  %1651 = vmatprep.subr.bf16.mxu0 %v2698_v8  ;;  %v2706_v13 = vld [vmem:[#allocation5 + $0x284] ss:$16 sps:$4 sm:$0xff]   ;;  %v2709_v15 = vld [vmem:[#allocation5 + $0x280] ss:$16 sps:$4 sm:$0xff]  }
  0x3c   :  { %1692 = vmatprep.subr.bf16.mxu1 %v2700_v9  ;;  %v2710_v16 = vld [vmem:[#allocation5 + $0x64] ss:$16 sps:$4 sm:$0xff]   ;;  %v2714_v18 = vld [vmem:[#allocation5 + $0x60] ss:$16 sps:$4 sm:$0xff]   ;;  %p3190_p10 = pnand %p3189_p9, %p3183_p6 }
  0x3d   :  { %v2712_v17 = vld [vmem:[#allocation5 + $0x264] ss:$16 sps:$4 sm:$0xff]   ;;  %v2715_v19 = vld [vmem:[#allocation5 + $0x260] ss:$16 sps:$4 sm:$0xff]  }
  0x3e   :  { %1652 = vmatpush1.bf16.msra.mxu0 %v2702_v10  ;;  %v2716_v20 = vld [vmem:[#allocation5 + $0x44] ss:$16 sps:$4 sm:$0xff]   ;;  %v2720_v22 = vld [vmem:[#allocation5 + $0x40] ss:$16 sps:$4 sm:$0xff]  }
  0x3f   :  { %1693 = vmatpush1.bf16.msra.mxu1 %v2703_v11  ;;  %1653 = vmatprep.subr.bf16.mxu0 %v2704_v12  ;;  %v2718_v21 = vld [vmem:[#allocation5 + $0x244] ss:$16 sps:$4 sm:$0xff]   ;;  %v2721_v23 = vld [vmem:[#allocation5 + $0x240] ss:$16 sps:$4 sm:$0xff]  }
  0x40   :  { %1694 = vmatprep.subr.bf16.mxu1 %v2706_v13  ;;  %v2722_v24 = vld [vmem:[#allocation5 + $0x24] ss:$16 sps:$4 sm:$0xff]   ;;  %v2726_v26 = vld [vmem:[#allocation5 + $0x20] ss:$16 sps:$4 sm:$0xff]  }
  0x41   :  { %v2724_v25 = vld [vmem:[#allocation5 + $0x224] ss:$16 sps:$4 sm:$0xff]   ;;  %v2727_v27 = vld [vmem:[#allocation5 + $0x220] ss:$16 sps:$4 sm:$0xff]  }
  0x42   :  { %1654 = vmatpush1.bf16.msra.mxu0 %v2708_v14  ;;  %v2728_v28 = vld [vmem:[#allocation5 + $0x4] ss:$16 sps:$4 sm:$0xff]   ;;  %v2732_v30 = vld [vmem:[#allocation5] ss:$16 sps:$4 sm:$0xff]  }
  0x43   :  { %1695 = vmatpush1.bf16.msra.mxu1 %v2709_v15  ;;  %1655 = vmatprep.subr.bf16.mxu0 %v2710_v16  ;;  %v2730_v29 = vld [vmem:[#allocation5 + $0x204] ss:$16 sps:$4 sm:$0xff]   ;;  %v2733_v31 = vld [vmem:[#allocation5 + $0x200] ss:$16 sps:$4 sm:$0xff]  }
  0x44   :  { %1696 = vmatprep.subr.bf16.mxu1 %v2712_v17  ;;  %v2734_v32 = vld [vmem:[#allocation5 + $0x1e4] ss:$16 sps:$4 sm:$0xff]   ;;  %v2738_v34 = vld [vmem:[#allocation5 + $0x1e0] ss:$16 sps:$4 sm:$0xff]  }
  0x45   :  { %v2736_v33 = vld [vmem:[#allocation5 + $0x3e4] ss:$16 sps:$4 sm:$0xff]   ;;  %v2739_v35 = vld [vmem:[#allocation5 + $0x3e0] ss:$16 sps:$4 sm:$0xff]  }
  0x46   :  { %1656 = vmatpush1.bf16.msra.mxu0 %v2714_v18  ;;  %v2740_v36 = vld [vmem:[#allocation5 + $0x1c4] ss:$16 sps:$4 sm:$0xff]   ;;  %v2744_v38 = vld [vmem:[#allocation5 + $0x1c0] ss:$16 sps:$4 sm:$0xff]  }
  0x47   :  { %1697 = vmatpush1.bf16.msra.mxu1 %v2715_v19  ;;  %1657 = vmatprep.subr.bf16.mxu0 %v2716_v20  ;;  %v2742_v37 = vld [vmem:[#allocation5 + $0x3c4] ss:$16 sps:$4 sm:$0xff]   ;;  %v2745_v39 = vld [vmem:[#allocation5 + $0x3c0] ss:$16 sps:$4 sm:$0xff]  }
  0x48   :  { %1698 = vmatprep.subr.bf16.mxu1 %v2718_v21  ;;  %v2746_v40 = vld [vmem:[#allocation5 + $0x1a4] ss:$16 sps:$4 sm:$0xff]   ;;  %v2750_v42 = vld [vmem:[#allocation5 + $0x1a0] ss:$16 sps:$4 sm:$0xff]  }
  0x49   :  { %v2748_v41 = vld [vmem:[#allocation5 + $0x3a4] ss:$16 sps:$4 sm:$0xff]   ;;  %v2751_v43 = vld [vmem:[#allocation5 + $0x3a0] ss:$16 sps:$4 sm:$0xff]  }
  0x4a   :  { %1658 = vmatpush1.bf16.msra.mxu0 %v2720_v22  ;;  %v2752_v44 = vld [vmem:[#allocation5 + $0x184] ss:$16 sps:$4 sm:$0xff]   ;;  %v2756_v47 = vld [vmem:[#allocation5 + $0x180] ss:$16 sps:$4 sm:$0xff]  }
  0x4b   :  { %1699 = vmatpush1.bf16.msra.mxu1 %v2721_v23  ;;  %1659 = vmatprep.subr.bf16.mxu0 %v2722_v24  ;;  %v2754_v45 = vld [vmem:[#allocation5 + $0x384] ss:$16 sps:$4 sm:$0xff]   ;;  %v2757_v48 = vld [vmem:[#allocation5 + $0x380] ss:$16 sps:$4 sm:$0xff]  }
  0x4c   :  { %1700 = vmatprep.subr.bf16.mxu1 %v2724_v25  ;;  %v2758_v51 = vld [vmem:[#allocation5 + $0x164] ss:$16 sps:$4 sm:$0xff]   ;;  %v2762_v54 = vld [vmem:[#allocation5 + $0x160] ss:$16 sps:$4 sm:$0xff]  }
  0x4d   :  { %v2760_v53 = vld [vmem:[#allocation5 + $0x364] ss:$16 sps:$4 sm:$0xff]   ;;  %v2763_v55 = vld [vmem:[#allocation5 + $0x360] ss:$16 sps:$4 sm:$0xff]  }
  0x4e   :  { %1660 = vmatpush1.bf16.msra.mxu0 %v2726_v26  ;;  %v2764_v56 = vld [vmem:[#allocation5 + $0x144] ss:$16 sps:$4 sm:$0xff]   ;;  %v2768_v58 = vld [vmem:[#allocation5 + $0x140] ss:$16 sps:$4 sm:$0xff]  }
  0x4f   :  { %1701 = vmatpush1.bf16.msra.mxu1 %v2727_v27  ;;  %1661 = vmatprep.subr.bf16.mxu0 %v2728_v28  ;;  %v2766_v57 = vld [vmem:[#allocation5 + $0x344] ss:$16 sps:$4 sm:$0xff]   ;;  %v2769_v59 = vld [vmem:[#allocation5 + $0x340] ss:$16 sps:$4 sm:$0xff]  }
  0x50   :  { %1702 = vmatprep.subr.bf16.mxu1 %v2730_v29  ;;  %v2770_v60 = vld [vmem:[#allocation5 + $0x124] ss:$16 sps:$4 sm:$0xff]   ;;  %v2774_v62 = vld [vmem:[#allocation5 + $0x120] ss:$16 sps:$4 sm:$0xff]  }
  0x51   :  { %v2772_v61 = vld [vmem:[#allocation5 + $0x324] ss:$16 sps:$4 sm:$0xff]   ;;  %v2775_v63 = vld [vmem:[#allocation5 + $0x320] ss:$16 sps:$4 sm:$0xff]  }
  0x52   :  { %1662 = vmatpush1.bf16.msra.mxu0 %v2732_v30  ;;  %v2776_v0 = vld [vmem:[#allocation5 + $0x104] ss:$16 sps:$4 sm:$0xff]   ;;  %v2780_v2 = vld [vmem:[#allocation5 + $0x100] ss:$16 sps:$4 sm:$0xff]  }
  0x53   :  { %1703 = vmatpush1.bf16.msra.mxu1 %v2733_v31  ;;  %1663 = vmatprep.subr.bf16.mxu0 %v2734_v32  ;;  %v2778_v1 = vld [vmem:[#allocation5 + $0x304] ss:$16 sps:$4 sm:$0xff]   ;;  %v2781_v3 = vld [vmem:[#allocation5 + $0x300] ss:$16 sps:$4 sm:$0xff]  }
  0x54   :  { %1704 = vmatprep.subr.bf16.mxu1 %v2736_v33  ;;  %v73_v4 = vld [vmem:[#allocation2] sm:$0xff]  ;;  %v75_v5 = vld [vmem:[#allocation2 + $0x10] sm:$0xff] }
  0x55   :  { %v2784_v6 = vld [vmem:[#allocation5 + $0x4e4] ss:$16 sps:$4 sm:$0xff]   ;;  %v3267_v8 = vpack.c.bf16 %v73_v4, %v73_v4  ;;  %v3269_v9 = vpack.c.bf16 %v75_v5, %v75_v5  ;;  %v2782_v10 = vld [vmem:[#allocation5 + $0x4e0] ss:$16 sps:$4 sm:$0xff]  }
  0x56   :  { %1664 = vmatpush2.bf16.msra.mxu0 %v2738_v34  ;;  %v2787_v7 = vld [vmem:[#allocation5 + $0x6e4] ss:$16 sps:$4 sm:$0xff]   ;;  %v2785_v11 = vld [vmem:[#allocation5 + $0x6e0] ss:$16 sps:$4 sm:$0xff]   ;;  %v78_v34 = vld [vmem:[#allocation2 + $0x28] sm:$0xff] }
  0x57   :  { %1705 = vmatpush2.bf16.msra.mxu1 %v2739_v35  ;;  %1665 = vmatprep.subr.bf16.mxu0 %v2740_v36  ;;  %v2790_v12 = vld [vmem:[#allocation5 + $0x4c4] ss:$16 sps:$4 sm:$0xff]   ;;  %v2788_v14 = vld [vmem:[#allocation5 + $0x4c0] ss:$16 sps:$4 sm:$0xff]  }
  0x58   :  { %1706 = vmatprep.subr.bf16.mxu1 %v2742_v37  ;;  %v2793_v13 = vld [vmem:[#allocation5 + $0x6c4] ss:$16 sps:$4 sm:$0xff]   ;;  %v2791_v15 = vld [vmem:[#allocation5 + $0x6c0] ss:$16 sps:$4 sm:$0xff]   ;;  %v3273_v37 = vpack.c.bf16 %v78_v34, %v78_v34  ;;  %v2896_v34 = vld [vmem:[#allocation5 + $0x88] ss:$16 sps:$4 sm:$0xff]  }
  0x59   :  { %v2796_v16 = vld [vmem:[#allocation5 + $0x4a4] ss:$16 sps:$4 sm:$0xff]   ;;  %v2794_v18 = vld [vmem:[#allocation5 + $0x4a0] ss:$16 sps:$4 sm:$0xff]  }
  0x5a   :  { %1666 = vmatpush2.bf16.msra.mxu0 %v2744_v38  ;;  %v2799_v17 = vld [vmem:[#allocation5 + $0x6a4] ss:$16 sps:$4 sm:$0xff]   ;;  %v2797_v19 = vld [vmem:[#allocation5 + $0x6a0] ss:$16 sps:$4 sm:$0xff]   ;;  %v80_v38 = vld [vmem:[#allocation2 + $0x38] sm:$0xff] }
  0x5b   :  { %1707 = vmatpush2.bf16.msra.mxu1 %v2745_v39  ;;  %1667 = vmatprep.subr.bf16.mxu0 %v2746_v40  ;;  %v2802_v20 = vld [vmem:[#allocation5 + $0x484] ss:$16 sps:$4 sm:$0xff]   ;;  %v2800_v22 = vld [vmem:[#allocation5 + $0x480] ss:$16 sps:$4 sm:$0xff]   ;;  %v3275_v40 = vpack.c.bf16 %v80_v38, %v80_v38  ;;  %v2907_v38 = vld [vmem:[#allocation5 + $0x26c] ss:$16 sps:$4 sm:$0xff]  }
  0x5c   :  { %1708 = vmatprep.subr.bf16.mxu1 %v2748_v41  ;;  %v2805_v21 = vld [vmem:[#allocation5 + $0x684] ss:$16 sps:$4 sm:$0xff]   ;;  %v2803_v23 = vld [vmem:[#allocation5 + $0x680] ss:$16 sps:$4 sm:$0xff]  }
  0x5d   :  { %v2808_v24 = vld [vmem:[#allocation5 + $0x464] ss:$16 sps:$4 sm:$0xff]   ;;  %v2806_v26 = vld [vmem:[#allocation5 + $0x460] ss:$16 sps:$4 sm:$0xff]  }
  0x5e   :  { %1668 = vmatpush2.bf16.msra.mxu0 %v2750_v42  ;;  %v2811_v25 = vld [vmem:[#allocation5 + $0x664] ss:$16 sps:$4 sm:$0xff]   ;;  %v2809_v27 = vld [vmem:[#allocation5 + $0x660] ss:$16 sps:$4 sm:$0xff]  }
  0x5f   :  { %1709 = vmatpush2.bf16.msra.mxu1 %v2751_v43  ;;  %1669 = vmatprep.subr.bf16.mxu0 %v2752_v44  ;;  %v2814_v28 = vld [vmem:[#allocation5 + $0x444] ss:$16 sps:$4 sm:$0xff]   ;;  %v2812_v30 = vld [vmem:[#allocation5 + $0x440] ss:$16 sps:$4 sm:$0xff]  }
  0x60   :  { %1710 = vmatprep.subr.bf16.mxu1 %v2754_v45  ;;  %v2817_v29 = vld [vmem:[#allocation5 + $0x644] ss:$16 sps:$4 sm:$0xff]   ;;  %v2815_v31 = vld [vmem:[#allocation5 + $0x640] ss:$16 sps:$4 sm:$0xff]  }
  0x61   :  { %v2820_v32 = vld [vmem:[#allocation5 + $0x424] ss:$16 sps:$4 sm:$0xff]   ;;  %v2818_v35 = vld [vmem:[#allocation5 + $0x420] ss:$16 sps:$4 sm:$0xff]  }
  0x62   :  { %1670 = vmatpush2.bf16.msra.mxu0 %v2756_v47  ;;  %v2823_v33 = vld [vmem:[#allocation5 + $0x624] ss:$16 sps:$4 sm:$0xff]   ;;  %v2821_v36 = vld [vmem:[#allocation5 + $0x620] ss:$16 sps:$4 sm:$0xff]  }
  0x63   :  { %1711 = vmatpush2.bf16.msra.mxu1 %v2757_v48  ;;  %1671 = vmatprep.subr.bf16.mxu0 %v2758_v51  ;;  %v2826_v39 = vld [vmem:[#allocation5 + $0x404] ss:$16 sps:$4 sm:$0xff]   ;;  %v2824_v42 = vld [vmem:[#allocation5 + $0x400] ss:$16 sps:$4 sm:$0xff]  }
  0x64   :  { %1712 = vmatprep.subr.bf16.mxu1 %v2760_v53  ;;  %v2829_v41 = vld [vmem:[#allocation5 + $0x604] ss:$16 sps:$4 sm:$0xff]   ;;  %v2827_v43 = vld [vmem:[#allocation5 + $0x600] ss:$16 sps:$4 sm:$0xff]  }
  0x65   :  { %v2832_v44 = vld [vmem:[#allocation5 + $0x5e4] ss:$16 sps:$4 sm:$0xff]   ;;  %v2830_v46 = vld [vmem:[#allocation5 + $0x5e0] ss:$16 sps:$4 sm:$0xff]  }
  0x66   :  { %1672 = vmatpush2.bf16.msra.mxu0 %v2762_v54  ;;  %v2835_v45 = vld [vmem:[#allocation5 + $0x7e4] ss:$16 sps:$4 sm:$0xff]   ;;  %v2833_v47 = vld [vmem:[#allocation5 + $0x7e0] ss:$16 sps:$4 sm:$0xff]  }
  0x67   :  { %1713 = vmatpush2.bf16.msra.mxu1 %v2763_v55  ;;  %1673 = vmatprep.subr.bf16.mxu0 %v2764_v56  ;;  %v2838_v48 = vld [vmem:[#allocation5 + $0x5c4] ss:$16 sps:$4 sm:$0xff]   ;;  %v2836_v51 = vld [vmem:[#allocation5 + $0x5c0] ss:$16 sps:$4 sm:$0xff]  }
  0x68   :  { %1714 = vmatprep.subr.bf16.mxu1 %v2766_v57  ;;  %v2841_v50 = vld [vmem:[#allocation5 + $0x7c4] ss:$16 sps:$4 sm:$0xff]   ;;  %v2839_v53 = vld [vmem:[#allocation5 + $0x7c0] ss:$16 sps:$4 sm:$0xff]  }
  0x69   :  { %v2844_v54 = vld [vmem:[#allocation5 + $0x5a4] ss:$16 sps:$4 sm:$0xff]   ;;  %v2842_v56 = vld [vmem:[#allocation5 + $0x5a0] ss:$16 sps:$4 sm:$0xff]  }
  0x6a   :  { %1674 = vmatpush2.bf16.msra.mxu0 %v2768_v58  ;;  %v2847_v55 = vld [vmem:[#allocation5 + $0x7a4] ss:$16 sps:$4 sm:$0xff]   ;;  %v2845_v57 = vld [vmem:[#allocation5 + $0x7a0] ss:$16 sps:$4 sm:$0xff]  }
  0x6b   :  { %1715 = vmatpush2.bf16.msra.mxu1 %v2769_v59  ;;  %1675 = vmatprep.subr.bf16.mxu0 %v2770_v60  ;;  %v2850_v58 = vld [vmem:[#allocation5 + $0x584] ss:$16 sps:$4 sm:$0xff]   ;;  %v2848_v60 = vld [vmem:[#allocation5 + $0x580] ss:$16 sps:$4 sm:$0xff]  }
  0x6c   :  { %1716 = vmatprep.subr.bf16.mxu1 %v2772_v61  ;;  %v2853_v59 = vld [vmem:[#allocation5 + $0x784] ss:$16 sps:$4 sm:$0xff]   ;;  %v2851_v61 = vld [vmem:[#allocation5 + $0x780] ss:$16 sps:$4 sm:$0xff]  }
  0x6d   :  { %v2860_v4 = vld [vmem:[#allocation5 + $0x540] ss:$16 sps:$4 sm:$0xff]  }
  0x6e   :  { %1676 = vmatpush2.bf16.msra.mxu0 %v2774_v62  ;;  %v2856_v62 = vld [vmem:[#allocation5 + $0x564] ss:$16 sps:$4 sm:$0xff]   ;;  %v2863_v5 = vld [vmem:[#allocation5 + $0x740] ss:$16 sps:$4 sm:$0xff]  }
  0x6f   :  { %1717 = vmatpush2.bf16.msra.mxu1 %v2775_v63  ;;  %1677 = vmatprep.subr.bf16.mxu0 %v2776_v0  ;;  %v2859_v63 = vld [vmem:[#allocation5 + $0x764] ss:$16 sps:$4 sm:$0xff]   ;;  %v2854_v0 = vld [vmem:[#allocation5 + $0x560] ss:$16 sps:$4 sm:$0xff]  }
  0x70   :  { %1718 = vmatprep.subr.bf16.mxu1 %v2778_v1  ;;  %v2857_v1 = vld [vmem:[#allocation5 + $0x760] ss:$16 sps:$4 sm:$0xff]  }
  0x72   :  { %1678 = vmatpush2.bf16.msra.mxu0 %v2780_v2  ;;  %v2862_v2 = vld [vmem:[#allocation5 + $0x544] ss:$16 sps:$4 sm:$0xff]  }
  0x73   :  { %1719 = vmatpush2.bf16.msra.mxu1 %v2781_v3  ;;  %1729 = vmatprep.subr.bf16.mxu0 %v2784_v6  ;;  %v2865_v3 = vld [vmem:[#allocation5 + $0x744] ss:$16 sps:$4 sm:$0xff]  }
  0x74   :  { %1770 = vmatprep.subr.bf16.mxu1 %v2787_v7  ;;  %v2868_v6 = vld [vmem:[#allocation5 + $0x524] ss:$16 sps:$4 sm:$0xff]  }
  0x75   :  { %1680 = vmatmul.mubr.bf16.vlgmr.msra.gmra.mxu0 %v3267_v8  ;;  %v2871_v7 = vld [vmem:[#allocation5 + $0x724] ss:$16 sps:$4 sm:$0xff]  }
  0x76   :  { %1721 = vmatmul.mubr.bf16.vlgmr.msra.gmra.mxu1 %v3269_v9  ;;  %1730 = vmatpush1.bf16.msra.mxu0 %v2782_v10  ;;  %v2866_v10 = vld [vmem:[#allocation5 + $0x520] ss:$16 sps:$4 sm:$0xff]  }
  0x77   :  { %1771 = vmatpush1.bf16.msra.mxu1 %v2785_v11  ;;  %1731 = vmatprep.subr.bf16.mxu0 %v2790_v12  ;;  %v2869_v11 = vld [vmem:[#allocation5 + $0x720] ss:$16 sps:$4 sm:$0xff]   ;;  %v2874_v12 = vld [vmem:[#allocation5 + $0x504] ss:$16 sps:$4 sm:$0xff]  }
  0x78   :  { %1772 = vmatprep.subr.bf16.mxu1 %v2793_v13  ;;  %1761 = vmatprep.mubr.bf16.mxu0 %v3273_v37  ;;  %v2877_v13 = vld [vmem:[#allocation5 + $0x704] ss:$16 sps:$4 sm:$0xff]  }
  0x79   :  { %1802 = vmatprep.mubr.bf16.mxu1 %v3275_v40 }
  0x7a   :  { %1732 = vmatpush1.bf16.msra.mxu0 %v2788_v14  ;;  %v2872_v14 = vld [vmem:[#allocation5 + $0x500] ss:$16 sps:$4 sm:$0xff]  }
  0x7b   :  { %1773 = vmatpush1.bf16.msra.mxu1 %v2791_v15  ;;  %1733 = vmatprep.subr.bf16.mxu0 %v2796_v16  ;;  %v2875_v15 = vld [vmem:[#allocation5 + $0x700] ss:$16 sps:$4 sm:$0xff]  }
  0x7c   :  { %1774 = vmatprep.subr.bf16.mxu1 %v2799_v17  ;;  %v77_v16 = vld [vmem:[#allocation2 + $0x20] sm:$0xff]  ;;  %v79_v17 = vld [vmem:[#allocation2 + $0x30] sm:$0xff] }
  0x7e   :  { %1734 = vmatpush1.bf16.msra.mxu0 %v2794_v18  ;;  %v2880_v18 = vld [vmem:[#allocation5 + $0xec] ss:$16 sps:$4 sm:$0xff]  }
  0x7f   :  { %1775 = vmatpush1.bf16.msra.mxu1 %v2797_v19  ;;  %1735 = vmatprep.subr.bf16.mxu0 %v2802_v20  ;;  %v2883_v19 = vld [vmem:[#allocation5 + $0x2ec] ss:$16 sps:$4 sm:$0xff]   ;;  %v3279_v20 = vpack.c.bf16 %v77_v16, %v77_v16 }
  0x80   :  { %1776 = vmatprep.subr.bf16.mxu1 %v2805_v21  ;;  %v3281_v21 = vpack.c.bf16 %v79_v17, %v79_v17  ;;  %v2964_v16 = vld [vmem:[#allocation5 + $0x12c] ss:$16 sps:$4 sm:$0xff]  }
  0x81   :  { %v2967_v17 = vld [vmem:[#allocation5 + $0x32c] ss:$16 sps:$4 sm:$0xff]  }
  0x82   :  { %1736 = vmatpush1.bf16.msra.mxu0 %v2800_v22  ;;  %v2878_v22 = vld [vmem:[#allocation5 + $0xe8] ss:$16 sps:$4 sm:$0xff]  }
  0x83   :  { %1777 = vmatpush1.bf16.msra.mxu1 %v2803_v23  ;;  %1737 = vmatprep.subr.bf16.mxu0 %v2808_v24  ;;  %v2881_v23 = vld [vmem:[#allocation5 + $0x2e8] ss:$16 sps:$4 sm:$0xff]   ;;  %v2886_v24 = vld [vmem:[#allocation5 + $0xcc] ss:$16 sps:$4 sm:$0xff]  }
  0x84   :  { %1778 = vmatprep.subr.bf16.mxu1 %v2811_v25  ;;  %v2889_v25 = vld [vmem:[#allocation5 + $0x2cc] ss:$16 sps:$4 sm:$0xff]  }
  0x86   :  { %1738 = vmatpush1.bf16.msra.mxu0 %v2806_v26  ;;  %v2884_v26 = vld [vmem:[#allocation5 + $0xc8] ss:$16 sps:$4 sm:$0xff]  }
  0x87   :  { %1779 = vmatpush1.bf16.msra.mxu1 %v2809_v27  ;;  %1739 = vmatprep.subr.bf16.mxu0 %v2814_v28  ;;  %v2887_v27 = vld [vmem:[#allocation5 + $0x2c8] ss:$16 sps:$4 sm:$0xff]   ;;  %v2892_v28 = vld [vmem:[#allocation5 + $0xac] ss:$16 sps:$4 sm:$0xff]  }
  0x88   :  { %1780 = vmatprep.subr.bf16.mxu1 %v2817_v29  ;;  %v2895_v29 = vld [vmem:[#allocation5 + $0x2ac] ss:$16 sps:$4 sm:$0xff]  }
  0x8a   :  { %1740 = vmatpush1.bf16.msra.mxu0 %v2812_v30  ;;  %v2890_v30 = vld [vmem:[#allocation5 + $0xa8] ss:$16 sps:$4 sm:$0xff]  }
  0x8b   :  { %1781 = vmatpush1.bf16.msra.mxu1 %v2815_v31  ;;  %1741 = vmatprep.subr.bf16.mxu0 %v2820_v32  ;;  %v2893_v31 = vld [vmem:[#allocation5 + $0x2a8] ss:$16 sps:$4 sm:$0xff]   ;;  %v2898_v32 = vld [vmem:[#allocation5 + $0x8c] ss:$16 sps:$4 sm:$0xff]  }
  0x8c   :  { %1782 = vmatprep.subr.bf16.mxu1 %v2823_v33  ;;  %v2901_v33 = vld [vmem:[#allocation5 + $0x28c] ss:$16 sps:$4 sm:$0xff]  }
  0x8e   :  { %1742 = vmatpush1.bf16.msra.mxu0 %v2818_v35  ;;  %v2899_v35 = vld [vmem:[#allocation5 + $0x288] ss:$16 sps:$4 sm:$0xff]  }
  0x8f   :  { %1783 = vmatpush1.bf16.msra.mxu1 %v2821_v36  ;;  %1743 = vmatprep.subr.bf16.mxu0 %v2826_v39  ;;  %v2904_v36 = vld [vmem:[#allocation5 + $0x6c] ss:$16 sps:$4 sm:$0xff]   ;;  %v2902_v39 = vld [vmem:[#allocation5 + $0x68] ss:$16 sps:$4 sm:$0xff]  }
  0x90   :  { %1784 = vmatprep.subr.bf16.mxu1 %v2829_v41  ;;  %v2913_v41 = vld [vmem:[#allocation5 + $0x24c] ss:$16 sps:$4 sm:$0xff]  }
  0x92   :  { %1744 = vmatpush1.bf16.msra.mxu0 %v2824_v42  ;;  %v2908_v42 = vld [vmem:[#allocation5 + $0x48] ss:$16 sps:$4 sm:$0xff]  }
  0x93   :  { %1785 = vmatpush1.bf16.msra.mxu1 %v2827_v43  ;;  %1745 = vmatprep.subr.bf16.mxu0 %v2832_v44  ;;  %v2911_v43 = vld [vmem:[#allocation5 + $0x248] ss:$16 sps:$4 sm:$0xff]   ;;  %v2916_v44 = vld [vmem:[#allocation5 + $0x2c] ss:$16 sps:$4 sm:$0xff]  }
  0x94   :  { %1786 = vmatprep.subr.bf16.mxu1 %v2835_v45  ;;  %v2919_v45 = vld [vmem:[#allocation5 + $0x22c] ss:$16 sps:$4 sm:$0xff]  }
  0x96   :  { %1746 = vmatpush2.bf16.msra.mxu0 %v2830_v46  ;;  %v2914_v46 = vld [vmem:[#allocation5 + $0x28] ss:$16 sps:$4 sm:$0xff]  }
  0x97   :  { %1787 = vmatpush2.bf16.msra.mxu1 %v2833_v47  ;;  %1747 = vmatprep.subr.bf16.mxu0 %v2838_v48  ;;  %v2917_v47 = vld [vmem:[#allocation5 + $0x228] ss:$16 sps:$4 sm:$0xff]   ;;  %v2922_v48 = vld [vmem:[#allocation5 + $0xc] ss:$16 sps:$4 sm:$0xff]  }
  0x98   :  { %1788 = vmatprep.subr.bf16.mxu1 %v2841_v50  ;;  %v2925_v50 = vld [vmem:[#allocation5 + $0x20c] ss:$16 sps:$4 sm:$0xff]  }
  0x9a   :  { %1748 = vmatpush2.bf16.msra.mxu0 %v2836_v51  ;;  %v2920_v51 = vld [vmem:[#allocation5 + $0x8] ss:$16 sps:$4 sm:$0xff]  }
  0x9b   :  { %1789 = vmatpush2.bf16.msra.mxu1 %v2839_v53  ;;  %1749 = vmatprep.subr.bf16.mxu0 %v2844_v54  ;;  %v2923_v53 = vld [vmem:[#allocation5 + $0x208] ss:$16 sps:$4 sm:$0xff]   ;;  %v2928_v54 = vld [vmem:[#allocation5 + $0x1ec] ss:$16 sps:$4 sm:$0xff]  }
  0x9c   :  { %1790 = vmatprep.subr.bf16.mxu1 %v2847_v55  ;;  %v2931_v55 = vld [vmem:[#allocation5 + $0x3ec] ss:$16 sps:$4 sm:$0xff]  }
  0x9e   :  { %1750 = vmatpush2.bf16.msra.mxu0 %v2842_v56  ;;  %v2926_v56 = vld [vmem:[#allocation5 + $0x1e8] ss:$16 sps:$4 sm:$0xff]  }
  0x9f   :  { %1791 = vmatpush2.bf16.msra.mxu1 %v2845_v57  ;;  %1751 = vmatprep.subr.bf16.mxu0 %v2850_v58  ;;  %v2929_v57 = vld [vmem:[#allocation5 + $0x3e8] ss:$16 sps:$4 sm:$0xff]   ;;  %v2934_v58 = vld [vmem:[#allocation5 + $0x1cc] ss:$16 sps:$4 sm:$0xff]  }
  0xa0   :  { %1792 = vmatprep.subr.bf16.mxu1 %v2853_v59  ;;  %v2937_v59 = vld [vmem:[#allocation5 + $0x3cc] ss:$16 sps:$4 sm:$0xff]  }
  0xa2   :  { %1752 = vmatpush2.bf16.msra.mxu0 %v2848_v60  ;;  %v2932_v60 = vld [vmem:[#allocation5 + $0x1c8] ss:$16 sps:$4 sm:$0xff]  }
  0xa3   :  { %1793 = vmatpush2.bf16.msra.mxu1 %v2851_v61  ;;  %1753 = vmatprep.subr.bf16.mxu0 %v2856_v62  ;;  %v2935_v61 = vld [vmem:[#allocation5 + $0x3c8] ss:$16 sps:$4 sm:$0xff]   ;;  %v2940_v62 = vld [vmem:[#allocation5 + $0x1ac] ss:$16 sps:$4 sm:$0xff]  }
  0xa4   :  { %1794 = vmatprep.subr.bf16.mxu1 %v2859_v63  ;;  %v2943_v63 = vld [vmem:[#allocation5 + $0x3ac] ss:$16 sps:$4 sm:$0xff]  }
  0xa6   :  { %1754 = vmatpush2.bf16.msra.mxu0 %v2854_v0  ;;  %v2938_v0 = vld [vmem:[#allocation5 + $0x1a8] ss:$16 sps:$4 sm:$0xff]  }
  0xa7   :  { %1795 = vmatpush2.bf16.msra.mxu1 %v2857_v1  ;;  %1755 = vmatprep.subr.bf16.mxu0 %v2862_v2  ;;  %v2941_v1 = vld [vmem:[#allocation5 + $0x3a8] ss:$16 sps:$4 sm:$0xff]   ;;  %v2946_v2 = vld [vmem:[#allocation5 + $0x18c] ss:$16 sps:$4 sm:$0xff]  }
  0xa8   :  { %1796 = vmatprep.subr.bf16.mxu1 %v2865_v3  ;;  %v2949_v3 = vld [vmem:[#allocation5 + $0x38c] ss:$16 sps:$4 sm:$0xff]  }
  0xaa   :  { %1756 = vmatpush2.bf16.msra.mxu0 %v2860_v4  ;;  %v2944_v4 = vld [vmem:[#allocation5 + $0x188] ss:$16 sps:$4 sm:$0xff]  }
  0xab   :  { %1797 = vmatpush2.bf16.msra.mxu1 %v2863_v5  ;;  %1757 = vmatprep.subr.bf16.mxu0 %v2868_v6  ;;  %v2947_v5 = vld [vmem:[#allocation5 + $0x388] ss:$16 sps:$4 sm:$0xff]   ;;  %v2952_v6 = vld [vmem:[#allocation5 + $0x16c] ss:$16 sps:$4 sm:$0xff]  }
  0xac   :  { %1798 = vmatprep.subr.bf16.mxu1 %v2871_v7  ;;  %v2955_v7 = vld [vmem:[#allocation5 + $0x36c] ss:$16 sps:$4 sm:$0xff]  }
  0xae   :  { %1758 = vmatpush2.bf16.msra.mxu0 %v2866_v10  ;;  %v2950_v10 = vld [vmem:[#allocation5 + $0x168] ss:$16 sps:$4 sm:$0xff]  }
  0xaf   :  { %1799 = vmatpush2.bf16.msra.mxu1 %v2869_v11  ;;  %1759 = vmatprep.subr.bf16.mxu0 %v2874_v12  ;;  %v2953_v11 = vld [vmem:[#allocation5 + $0x368] ss:$16 sps:$4 sm:$0xff]   ;;  %v2958_v12 = vld [vmem:[#allocation5 + $0x14c] ss:$16 sps:$4 sm:$0xff]  }
  0xb0   :  { %1800 = vmatprep.subr.bf16.mxu1 %v2877_v13  ;;  %v2961_v13 = vld [vmem:[#allocation5 + $0x34c] ss:$16 sps:$4 sm:$0xff]  }
  0xb2   :  { %1760 = vmatpush2.bf16.msra.mxu0 %v2872_v14  ;;  %v2956_v14 = vld [vmem:[#allocation5 + $0x148] ss:$16 sps:$4 sm:$0xff]  }
  0xb3   :  { %1801 = vmatpush2.bf16.msra.mxu1 %v2875_v15  ;;  %1811 = vmatprep.subr.bf16.mxu0 %v2880_v18  ;;  %v2959_v15 = vld [vmem:[#allocation5 + $0x348] ss:$16 sps:$4 sm:$0xff]  }
  0xb4   :  { %1852 = vmatprep.subr.bf16.mxu1 %v2883_v19  ;;  %v2962_v18 = vld [vmem:[#allocation5 + $0x128] ss:$16 sps:$4 sm:$0xff]  }
  0xb5   :  { %1762 = vmatmul.mubr.bf16.vlgmr.msra.gmra.mxu0 %v3279_v20  ;;  %v2965_v19 = vld [vmem:[#allocation5 + $0x328] ss:$16 sps:$4 sm:$0xff]  }
  0xb6   :  { %1803 = vmatmul.mubr.bf16.vlgmr.msra.gmra.mxu1 %v3281_v21  ;;  %1812 = vmatpush1.bf16.msra.mxu0 %v2878_v22  ;;  %v2970_v22 = vld [vmem:[#allocation5 + $0x10c] ss:$16 sps:$4 sm:$0xff]  }
  0xb7   :  { %1853 = vmatpush1.bf16.msra.mxu1 %v2881_v23  ;;  %1813 = vmatprep.subr.bf16.mxu0 %v2886_v24  ;;  %v2973_v23 = vld [vmem:[#allocation5 + $0x30c] ss:$16 sps:$4 sm:$0xff]   ;;  %v2968_v24 = vld [vmem:[#allocation5 + $0x108] ss:$16 sps:$4 sm:$0xff]  }
  0xb8   :  { %1854 = vmatprep.subr.bf16.mxu1 %v2889_v25  ;;  %1843 = vmatprep.mubr.bf16.mxu0 %v3261_v49  ;;  %v2905_v49 = vld [vmem:[#allocation5 + $0x268] ss:$16 sps:$4 sm:$0xff]  }
  0xb9   :  { %1884 = vmatprep.mubr.bf16.mxu1 %v3263_v52  ;;  %v2910_v52 = vld [vmem:[#allocation5 + $0x4c] ss:$16 sps:$4 sm:$0xff]   ;;  %v2971_v25 = vld [vmem:[#allocation5 + $0x308] ss:$16 sps:$4 sm:$0xff]  }
  0xba   :  { %1814 = vmatpush1.bf16.msra.mxu0 %v2884_v26  ;;  %v2976_v26 = vld [vmem:[#allocation5 + $0x4ec] ss:$16 sps:$4 sm:$0xff]  }
  0xbb   :  { %1855 = vmatpush1.bf16.msra.mxu1 %v2887_v27  ;;  %1815 = vmatprep.subr.bf16.mxu0 %v2892_v28  ;;  %v2979_v27 = vld [vmem:[#allocation5 + $0x6ec] ss:$16 sps:$4 sm:$0xff]   ;;  %v2974_v28 = vld [vmem:[#allocation5 + $0x4e8] ss:$16 sps:$4 sm:$0xff]  }
  0xbc   :  { %1856 = vmatprep.subr.bf16.mxu1 %v2895_v29  ;;  %v2977_v29 = vld [vmem:[#allocation5 + $0x6e8] ss:$16 sps:$4 sm:$0xff]  }
  0xbe   :  { %1816 = vmatpush1.bf16.msra.mxu0 %v2890_v30  ;;  %v2982_v30 = vld [vmem:[#allocation5 + $0x4cc] ss:$16 sps:$4 sm:$0xff]  }
  0xbf   :  { %1857 = vmatpush1.bf16.msra.mxu1 %v2893_v31  ;;  %1817 = vmatprep.subr.bf16.mxu0 %v2898_v32  ;;  %v2985_v31 = vld [vmem:[#allocation5 + $0x6cc] ss:$16 sps:$4 sm:$0xff]   ;;  %v2980_v32 = vld [vmem:[#allocation5 + $0x4c8] ss:$16 sps:$4 sm:$0xff]  }
  0xc0   :  { %1858 = vmatprep.subr.bf16.mxu1 %v2901_v33  ;;  %v2983_v33 = vld [vmem:[#allocation5 + $0x6c8] ss:$16 sps:$4 sm:$0xff]  }
  0xc2   :  { %1818 = vmatpush1.bf16.msra.mxu0 %v2896_v34  ;;  %v2988_v34 = vld [vmem:[#allocation5 + $0x4ac] ss:$16 sps:$4 sm:$0xff]  }
  0xc3   :  { %1859 = vmatpush1.bf16.msra.mxu1 %v2899_v35  ;;  %1819 = vmatprep.subr.bf16.mxu0 %v2904_v36  ;;  %v2991_v35 = vld [vmem:[#allocation5 + $0x6ac] ss:$16 sps:$4 sm:$0xff]   ;;  %v2986_v36 = vld [vmem:[#allocation5 + $0x4a8] ss:$16 sps:$4 sm:$0xff]  }
  0xc4   :  { %1860 = vmatprep.subr.bf16.mxu1 %v2907_v38  ;;  %v2989_v38 = vld [vmem:[#allocation5 + $0x6a8] ss:$16 sps:$4 sm:$0xff]  }
  0xc6   :  { %1820 = vmatpush1.bf16.msra.mxu0 %v2902_v39  ;;  %v2994_v39 = vld [vmem:[#allocation5 + $0x48c] ss:$16 sps:$4 sm:$0xff]  }
  0xc7   :  { %1861 = vmatpush1.bf16.msra.mxu1 %v2905_v49  ;;  %1821 = vmatprep.subr.bf16.mxu0 %v2910_v52  ;;  %v2995_v49 = vld [vmem:[#allocation5 + $0x688] ss:$16 sps:$4 sm:$0xff]   ;;  %v3000_v52 = vld [vmem:[#allocation5 + $0x46c] ss:$16 sps:$4 sm:$0xff]  }
  0xc8   :  { %1862 = vmatprep.subr.bf16.mxu1 %v2913_v41  ;;  %v3003_v41 = vld [vmem:[#allocation5 + $0x66c] ss:$16 sps:$4 sm:$0xff]  }
  0xca   :  { %1822 = vmatpush1.bf16.msra.mxu0 %v2908_v42  ;;  %v3006_v42 = vld [vmem:[#allocation5 + $0x44c] ss:$16 sps:$4 sm:$0xff]  }
  0xcb   :  { %1863 = vmatpush1.bf16.msra.mxu1 %v2911_v43  ;;  %1823 = vmatprep.subr.bf16.mxu0 %v2916_v44  ;;  %v3009_v43 = vld [vmem:[#allocation5 + $0x64c] ss:$16 sps:$4 sm:$0xff]   ;;  %v3004_v44 = vld [vmem:[#allocation5 + $0x448] ss:$16 sps:$4 sm:$0xff]  }
  0xcc   :  { %1864 = vmatprep.subr.bf16.mxu1 %v2919_v45  ;;  %v3007_v45 = vld [vmem:[#allocation5 + $0x648] ss:$16 sps:$4 sm:$0xff]  }
  0xce   :  { %1824 = vmatpush1.bf16.msra.mxu0 %v2914_v46  ;;  %v3012_v46 = vld [vmem:[#allocation5 + $0x42c] ss:$16 sps:$4 sm:$0xff]  }
  0xcf   :  { %1865 = vmatpush1.bf16.msra.mxu1 %v2917_v47  ;;  %1825 = vmatprep.subr.bf16.mxu0 %v2922_v48  ;;  %v3015_v47 = vld [vmem:[#allocation5 + $0x62c] ss:$16 sps:$4 sm:$0xff]   ;;  %v3010_v48 = vld [vmem:[#allocation5 + $0x428] ss:$16 sps:$4 sm:$0xff]  }
  0xd0   :  { %1866 = vmatprep.subr.bf16.mxu1 %v2925_v50  ;;  %v3013_v50 = vld [vmem:[#allocation5 + $0x628] ss:$16 sps:$4 sm:$0xff]  }
  0xd2   :  { %1826 = vmatpush1.bf16.msra.mxu0 %v2920_v51  ;;  %v3018_v51 = vld [vmem:[#allocation5 + $0x40c] ss:$16 sps:$4 sm:$0xff]  }
  0xd3   :  { %1867 = vmatpush1.bf16.msra.mxu1 %v2923_v53  ;;  %1827 = vmatprep.subr.bf16.mxu0 %v2928_v54  ;;  %v3021_v53 = vld [vmem:[#allocation5 + $0x60c] ss:$16 sps:$4 sm:$0xff]   ;;  %v3016_v54 = vld [vmem:[#allocation5 + $0x408] ss:$16 sps:$4 sm:$0xff]  }
  0xd4   :  { %1868 = vmatprep.subr.bf16.mxu1 %v2931_v55  ;;  %v3019_v55 = vld [vmem:[#allocation5 + $0x608] ss:$16 sps:$4 sm:$0xff]  }
  0xd6   :  { %1828 = vmatpush2.bf16.msra.mxu0 %v2926_v56  ;;  %v3024_v56 = vld [vmem:[#allocation5 + $0x5ec] ss:$16 sps:$4 sm:$0xff]  }
  0xd7   :  { %1869 = vmatpush2.bf16.msra.mxu1 %v2929_v57  ;;  %1829 = vmatprep.subr.bf16.mxu0 %v2934_v58  ;;  %v3027_v57 = vld [vmem:[#allocation5 + $0x7ec] ss:$16 sps:$4 sm:$0xff]   ;;  %v3022_v58 = vld [vmem:[#allocation5 + $0x5e8] ss:$16 sps:$4 sm:$0xff]  }
  0xd8   :  { %1870 = vmatprep.subr.bf16.mxu1 %v2937_v59  ;;  %v3025_v59 = vld [vmem:[#allocation5 + $0x7e8] ss:$16 sps:$4 sm:$0xff]  }
  0xda   :  { %1830 = vmatpush2.bf16.msra.mxu0 %v2932_v60  ;;  %v3030_v60 = vld [vmem:[#allocation5 + $0x5cc] ss:$16 sps:$4 sm:$0xff]  }
  0xdb   :  { %1871 = vmatpush2.bf16.msra.mxu1 %v2935_v61  ;;  %1831 = vmatprep.subr.bf16.mxu0 %v2940_v62  ;;  %v3033_v61 = vld [vmem:[#allocation5 + $0x7cc] ss:$16 sps:$4 sm:$0xff]   ;;  %v3028_v62 = vld [vmem:[#allocation5 + $0x5c8] ss:$16 sps:$4 sm:$0xff]  }
  0xdc   :  { %1872 = vmatprep.subr.bf16.mxu1 %v2943_v63  ;;  %v3031_v63 = vld [vmem:[#allocation5 + $0x7c8] ss:$16 sps:$4 sm:$0xff]  }
  0xde   :  { %1832 = vmatpush2.bf16.msra.mxu0 %v2938_v0  ;;  %v3036_v0 = vld [vmem:[#allocation5 + $0x5ac] ss:$16 sps:$4 sm:$0xff]  }
  0xdf   :  { %1873 = vmatpush2.bf16.msra.mxu1 %v2941_v1  ;;  %1833 = vmatprep.subr.bf16.mxu0 %v2946_v2  ;;  %v3039_v1 = vld [vmem:[#allocation5 + $0x7ac] ss:$16 sps:$4 sm:$0xff]   ;;  %v3034_v2 = vld [vmem:[#allocation5 + $0x5a8] ss:$16 sps:$4 sm:$0xff]  }
  0xe0   :  { %1874 = vmatprep.subr.bf16.mxu1 %v2949_v3  ;;  %v3037_v3 = vld [vmem:[#allocation5 + $0x7a8] ss:$16 sps:$4 sm:$0xff]  }
  0xe2   :  { %1834 = vmatpush2.bf16.msra.mxu0 %v2944_v4  ;;  %v3042_v4 = vld [vmem:[#allocation5 + $0x58c] ss:$16 sps:$4 sm:$0xff]  }
  0xe3   :  { %1875 = vmatpush2.bf16.msra.mxu1 %v2947_v5  ;;  %1835 = vmatprep.subr.bf16.mxu0 %v2952_v6  ;;  %v3045_v5 = vld [vmem:[#allocation5 + $0x78c] ss:$16 sps:$4 sm:$0xff]   ;;  %v3040_v6 = vld [vmem:[#allocation5 + $0x588] ss:$16 sps:$4 sm:$0xff]  }
  0xe4   :  { %1876 = vmatprep.subr.bf16.mxu1 %v2955_v7  ;;  %v3043_v7 = vld [vmem:[#allocation5 + $0x788] ss:$16 sps:$4 sm:$0xff]  }
  0xe6   :  { %1836 = vmatpush2.bf16.msra.mxu0 %v2950_v10  ;;  %v3048_v10 = vld [vmem:[#allocation5 + $0x56c] ss:$16 sps:$4 sm:$0xff]  }
  0xe7   :  { %1877 = vmatpush2.bf16.msra.mxu1 %v2953_v11  ;;  %1837 = vmatprep.subr.bf16.mxu0 %v2958_v12  ;;  %v3051_v11 = vld [vmem:[#allocation5 + $0x76c] ss:$16 sps:$4 sm:$0xff]   ;;  %v3046_v12 = vld [vmem:[#allocation5 + $0x568] ss:$16 sps:$4 sm:$0xff]  }
  0xe8   :  { %1878 = vmatprep.subr.bf16.mxu1 %v2961_v13  ;;  %v3049_v13 = vld [vmem:[#allocation5 + $0x768] ss:$16 sps:$4 sm:$0xff]  }
  0xea   :  { %1838 = vmatpush2.bf16.msra.mxu0 %v2956_v14  ;;  %v3054_v14 = vld [vmem:[#allocation5 + $0x54c] ss:$16 sps:$4 sm:$0xff]  }
  0xeb   :  { %1879 = vmatpush2.bf16.msra.mxu1 %v2959_v15  ;;  %1839 = vmatprep.subr.bf16.mxu0 %v2964_v16  ;;  %v3057_v15 = vld [vmem:[#allocation5 + $0x74c] ss:$16 sps:$4 sm:$0xff]   ;;  %v3052_v16 = vld [vmem:[#allocation5 + $0x548] ss:$16 sps:$4 sm:$0xff]  }
  0xec   :  { %1880 = vmatprep.subr.bf16.mxu1 %v2967_v17  ;;  %v3055_v17 = vld [vmem:[#allocation5 + $0x748] ss:$16 sps:$4 sm:$0xff]  }
  0xee   :  { %1840 = vmatpush2.bf16.msra.mxu0 %v2962_v18  ;;  %v3060_v18 = vld [vmem:[#allocation5 + $0x52c] ss:$16 sps:$4 sm:$0xff]  }
  0xef   :  { %1881 = vmatpush2.bf16.msra.mxu1 %v2965_v19  ;;  %1841 = vmatprep.subr.bf16.mxu0 %v2970_v22  ;;  %v3063_v19 = vld [vmem:[#allocation5 + $0x72c] ss:$16 sps:$4 sm:$0xff]   ;;  %v3058_v22 = vld [vmem:[#allocation5 + $0x528] ss:$16 sps:$4 sm:$0xff]  }
  0xf0   :  { %1882 = vmatprep.subr.bf16.mxu1 %v2973_v23  ;;  %v3061_v23 = vld [vmem:[#allocation5 + $0x728] ss:$16 sps:$4 sm:$0xff]  }
  0xf2   :  { %1842 = vmatpush2.bf16.msra.mxu0 %v2968_v24  ;;  %v3066_v24 = vld [vmem:[#allocation5 + $0x50c] ss:$16 sps:$4 sm:$0xff]  }
  0xf3   :  { %1883 = vmatpush2.bf16.msra.mxu1 %v2971_v25  ;;  %1893 = vmatprep.subr.bf16.mxu0 %v2976_v26  ;;  %v3069_v25 = vld [vmem:[#allocation5 + $0x70c] ss:$16 sps:$4 sm:$0xff]   ;;  %v3064_v26 = vld [vmem:[#allocation5 + $0x508] ss:$16 sps:$4 sm:$0xff]  }
  0xf4   :  { %1934 = vmatprep.subr.bf16.mxu1 %v2979_v27  ;;  %v3067_v27 = vld [vmem:[#allocation5 + $0x708] ss:$16 sps:$4 sm:$0xff]  }
  0xf5   :  { %1844 = vmatmul.mubr.bf16.vlgmr.msra.gmra.mxu0 %v3267_v8  ;;  %v2997_v8 = vld [vmem:[#allocation5 + $0x68c] ss:$16 sps:$4 sm:$0xff]  }
  0xf6   :  { %1885 = vmatmul.mubr.bf16.vlgmr.msra.gmra.mxu1 %v3269_v9  ;;  %1894 = vmatpush1.bf16.msra.mxu0 %v2974_v28  ;;  %v2992_v9 = vld [vmem:[#allocation5 + $0x488] ss:$16 sps:$4 sm:$0xff]   ;;  %v3070_v28 = vld [vmem:[#allocation8 + $0x78] sm:$0xff]  }
  0xf7   :  { %1935 = vmatpush1.bf16.msra.mxu1 %v2977_v29  ;;  %1895 = vmatprep.subr.bf16.mxu0 %v2982_v30  ;;  %v3071_v29 = vld [vmem:[#allocation8 + $0x38] sm:$0xff]   ;;  %v3072_v30 = vld [vmem:[#allocation8 + $0x70] sm:$0xff]  }
  0xf8   :  { %1936 = vmatprep.subr.bf16.mxu1 %v2985_v31  ;;  %1925 = vmatprep.mubr.bf16.mxu0 %v3273_v37  ;;  %v2998_v37 = vld [vmem:[#allocation5 + $0x468] ss:$16 sps:$4 sm:$0xff]  }
  0xf9   :  { %1966 = vmatprep.mubr.bf16.mxu1 %v3275_v40  ;;  %v3001_v40 = vld [vmem:[#allocation5 + $0x668] ss:$16 sps:$4 sm:$0xff]  }
  0xfa   :  { %1896 = vmatpush1.bf16.msra.mxu0 %v2980_v32 }
  0xfb   :  { %1937 = vmatpush1.bf16.msra.mxu1 %v2983_v33  ;;  %1897 = vmatprep.subr.bf16.mxu0 %v2988_v34  ;;  %v3073_v33 = vld [vmem:[#allocation8 + $0x30] sm:$0xff]  }
  0xfc   :  { %1938 = vmatprep.subr.bf16.mxu1 %v2991_v35 }
  0xfe   :  { %1898 = vmatpush1.bf16.msra.mxu0 %v2986_v36  ;;  %v3074_v36 = vld [vmem:[#allocation8 + $0x68] sm:$0xff]  }
  0xff   :  { %1939 = vmatpush1.bf16.msra.mxu1 %v2989_v38  ;;  %1899 = vmatprep.subr.bf16.mxu0 %v2994_v39 }
 0x100   :  { %1940 = vmatprep.subr.bf16.mxu1 %v2997_v8  ;;  %v3075_v8 = vld [vmem:[#allocation8 + $0x28] sm:$0xff]  }
 0x102   :  { %1900 = vmatpush1.bf16.msra.mxu0 %v2992_v9  ;;  %v3076_v9 = vld [vmem:[#allocation8 + $0x60] sm:$0xff]  }
 0x103   :  { %1941 = vmatpush1.bf16.msra.mxu1 %v2995_v49  ;;  %1901 = vmatprep.subr.bf16.mxu0 %v3000_v52 }
 0x104   :  { %1942 = vmatprep.subr.bf16.mxu1 %v3003_v41  ;;  %v3086_v41 = vld [vmem:[#allocation8 + $0xf8] sm:$0xff]  }
 0x106   :  { %1902 = vmatpush1.bf16.msra.mxu0 %v2998_v37  ;;  %v3087_v37 = vld [vmem:[#allocation8 + $0xb8] sm:$0xff]  }
 0x107   :  { %1943 = vmatpush1.bf16.msra.mxu1 %v3001_v40  ;;  %1903 = vmatprep.subr.bf16.mxu0 %v3006_v42  ;;  %v3089_v40 = vld [vmem:[#allocation8 + $0xb0] sm:$0xff]   ;;  %v3078_v42 = vld [vmem:[#allocation8 + $0x58] sm:$0xff]  }
 0x108   :  { %1944 = vmatprep.subr.bf16.mxu1 %v3009_v43  ;;  %v3090_v43 = vld [vmem:[#allocation8 + $0xe8] sm:$0xff]  }
 0x10a   :  { %1904 = vmatpush1.bf16.msra.mxu0 %v3004_v44  ;;  %v3079_v44 = vld [vmem:[#allocation8 + $0x18] sm:$0xff]  }
 0x10b   :  { %1945 = vmatpush1.bf16.msra.mxu1 %v3007_v45  ;;  %1905 = vmatprep.subr.bf16.mxu0 %v3012_v46  ;;  %v3091_v45 = vld [vmem:[#allocation8 + $0xa8] sm:$0xff]   ;;  %v3080_v46 = vld [vmem:[#allocation8 + $0x50] sm:$0xff]  }
 0x10c   :  { %1946 = vmatprep.subr.bf16.mxu1 %v3015_v47  ;;  %v3092_v47 = vld [vmem:[#allocation8 + $0xe0] sm:$0xff]  }
 0x10e   :  { %1906 = vmatpush1.bf16.msra.mxu0 %v3010_v48  ;;  %v3081_v48 = vld [vmem:[#allocation8 + $0x10] sm:$0xff]  }
 0x10f   :  { %1947 = vmatpush1.bf16.msra.mxu1 %v3013_v50  ;;  %1907 = vmatprep.subr.bf16.mxu0 %v3018_v51  ;;  %v3093_v50 = vld [vmem:[#allocation8 + $0xa0] sm:$0xff]   ;;  %v3082_v51 = vld [vmem:[#allocation8 + $0x48] sm:$0xff]  }
 0x110   :  { %1948 = vmatprep.subr.bf16.mxu1 %v3021_v53  ;;  %v3094_v53 = vld [vmem:[#allocation8 + $0xd8] sm:$0xff]  }
 0x112   :  { %1908 = vmatpush1.bf16.msra.mxu0 %v3016_v54  ;;  %v3083_v54 = vld [vmem:[#allocation8 + $0x8] sm:$0xff]  }
 0x113   :  { %1949 = vmatpush1.bf16.msra.mxu1 %v3019_v55  ;;  %1909 = vmatprep.subr.bf16.mxu0 %v3024_v56  ;;  %v3095_v55 = vld [vmem:[#allocation8 + $0x98] sm:$0xff]   ;;  %v3084_v56 = vld [vmem:[#allocation8 + $0x40] sm:$0xff]  }
 0x114   :  { %1950 = vmatprep.subr.bf16.mxu1 %v3027_v57  ;;  %v3085_v57 = vld [vmem:[#allocation8] sm:$0xff]  }
 0x116   :  { %1910 = vmatpush2.bf16.msra.mxu0 %v3022_v58  ;;  %v347_v58 = vlaneseq }
 0x117   :  { %1951 = vmatpush2.bf16.msra.mxu1 %v3025_v59  ;;  %1911 = vmatprep.subr.bf16.mxu0 %v3030_v60 }
 0x118   :  { %1952 = vmatprep.subr.bf16.mxu1 %v3033_v61  ;;  %v348_v59 = vshrl.u32 %v347_v58, 7  ;;  %v345_v61 = vld [vmem:[#allocation7] sm:$0xf] }
 0x11a   :  { %1912 = vmatpush2.bf16.msra.mxu0 %v3028_v62  ;;  %v349_v60 = vsub.s32 0, %v348_v59  ;;  %v353_v62 = vsub.s32 1, %v348_v59 }
 0x11b   :  { %1953 = vmatpush2.bf16.msra.mxu1 %v3031_v63  ;;  %1913 = vmatprep.subr.bf16.mxu0 %v3036_v0 }
 0x11c   :  { %1954 = vmatprep.subr.bf16.mxu1 %v3039_v1  ;;  %v350_v63 = vrot.slane %v345_v61, %v349_v60  ;;  %v354_v0 = vrot.slane %v345_v61, %v353_v62 }
 0x11e   :  { %1914 = vmatpush2.bf16.msra.mxu0 %v3034_v2 }
 0x11f   :  { %1955 = vmatpush2.bf16.msra.mxu1 %v3037_v3  ;;  %1915 = vmatprep.subr.bf16.mxu0 %v3042_v4  ;;  %v3096_v3 = vld [vmem:[#allocation8 + $0xd0] sm:$0xff]  }
 0x120   :  { %1956 = vmatprep.subr.bf16.mxu1 %v3045_v5  ;;  %v3097_v5 = vld [vmem:[#allocation8 + $0x90] sm:$0xff]  }
 0x122   :  { %1916 = vmatpush2.bf16.msra.mxu0 %v3040_v6 }
 0x123   :  { %1957 = vmatpush2.bf16.msra.mxu1 %v3043_v7  ;;  %1917 = vmatprep.subr.bf16.mxu0 %v3048_v10 }
 0x124   :  { %1958 = vmatprep.subr.bf16.mxu1 %v3051_v11 }
 0x126   :  { %1918 = vmatpush2.bf16.msra.mxu0 %v3046_v12 }
 0x127   :  { %1959 = vmatpush2.bf16.msra.mxu1 %v3049_v13  ;;  %1919 = vmatprep.subr.bf16.mxu0 %v3054_v14  ;;  %v3098_v14 = vld [vmem:[#allocation8 + $0xc8] sm:$0xff]  }
 0x128   :  { %1960 = vmatprep.subr.bf16.mxu1 %v3057_v15 }
 0x12a   :  { %1920 = vmatpush2.bf16.msra.mxu0 %v3052_v16 }
 0x12b   :  { %1961 = vmatpush2.bf16.msra.mxu1 %v3055_v17  ;;  %1921 = vmatprep.subr.bf16.mxu0 %v3060_v18  ;;  %v3099_v17 = vld [vmem:[#allocation8 + $0x88] sm:$0xff]  }
 0x12c   :  { %1962 = vmatprep.subr.bf16.mxu1 %v3063_v19 }
 0x12e   :  { %1922 = vmatpush2.bf16.msra.mxu0 %v3058_v22 }
 0x12f   :  { %1963 = vmatpush2.bf16.msra.mxu1 %v3061_v23  ;;  %1923 = vmatprep.subr.bf16.mxu0 %v3066_v24 }
 0x130   :  { %1964 = vmatprep.subr.bf16.mxu1 %v3069_v25 }
 0x132   :  { %1924 = vmatpush2.bf16.msra.mxu0 %v3064_v26  ;;  %v3100_v26 = vld [vmem:[#allocation8 + $0xc0] sm:$0xff]  }
 0x133   :  { %1965 = vmatpush2.bf16.msra.mxu1 %v3067_v27  ;;  %2633 = vmatprep.subr.bf16.mxu0 %v3070_v28  ;;  %v3101_v28 = vld [vmem:[#allocation8 + $0x80] sm:$0xff]  }
 0x134   :  { %2655 = vmatprep.subr.bf16.mxu1 %v3086_v41 }
 0x135   :  { %v3291_v31 = vpop.f32.mrf.mxu0  ;;  %1926 = vmatmul.mubr.bf16.vlgmr.msra.gmra.mxu0 %v3279_v20  ;;  %v3088_v20 = vld [vmem:[#allocation8 + $0xf0] sm:$0xff]  }
 0x136   :  { %v3293_v32 = vpop.f32.mrf.mxu1  ;;  %1967 = vmatmul.mubr.bf16.vlgmr.msra.gmra.mxu1 %v3281_v21  ;;  %2634 = vmatpush3.bf16.msra.mxu0 %v3071_v29  ;;  %v3077_v21 = vld [vmem:[#allocation8 + $0x20] sm:$0xff]   ;;  %v1682_v1 = vadd.f32 %v3291_v31, %v350_v63 }
 0x137   :  { %v1683_v34 = vpop.f32.mrf.mxu0  ;;  %2635 = vmatprep.subr.bf16.mxu0 %v3072_v30  ;;  %2656 = vmatpush3.bf16.msra.mxu1 %v3087_v37 }
 0x138   :  { %v3297_v35 = vpop.f32.mrf.mxu1  ;;  %2657 = vmatprep.subr.bf16.mxu1 %v3088_v20  ;;  %v1684_v2 = vadd.f32 %v1683_v34, %v354_v0  ;;  %v1723_v4 = vadd.f32 %v3293_v32, %v1682_v1  ;;  %v2600_v0 = vld [vmem:[%s3312_s4] ss:$0 sm:$0xff] }
 0x139   :  { %v1685_v38 = vpop.f32.mrf.mxu0 }
 0x13a   :  { %v1726_v39 = vpop.f32.mrf.mxu1  ;;  %2636 = vmatpush3.bf16.msra.mxu0 %v3073_v33  ;;  %v1725_v10 = vadd.f32 %v3297_v35, %v1684_v2 }
 0x13b   :  { %v1686_v49 = vpop.f32.mrf.mxu0  ;;  %2637 = vmatprep.subr.bf16.mxu0 %v3074_v36  ;;  %2658 = vmatpush3.bf16.msra.mxu1 %v3089_v40 }
 0x13c   :  { %v1727_v52 = vpop.f32.mrf.mxu1  ;;  %2659 = vmatprep.subr.bf16.mxu1 %v3090_v43 }
 0x13e   :  { %2638 = vmatpush3.bf16.msra.mxu0 %v3075_v8  ;;  %v357_v8 = vsub.s32 2, %v348_v59 }
 0x13f   :  { %2639 = vmatprep.subr.bf16.mxu0 %v3076_v9  ;;  %2660 = vmatpush3.bf16.msra.mxu1 %v3091_v45  ;;  %v361_v9 = vsub.s32 3, %v348_v59 }
 0x140   :  { %2661 = vmatprep.subr.bf16.mxu1 %v3092_v47  ;;  %v358_v49 = vrot.slane %v345_v61, %v357_v8 }
 0x141   :  { %v362_v52 = vrot.slane %v345_v61, %v361_v9 }
 0x142   :  { %2640 = vmatpush3.bf16.msra.mxu0 %v3077_v21 }
 0x143   :  { %2641 = vmatprep.subr.bf16.mxu0 %v3078_v42  ;;  %2662 = vmatpush3.bf16.msra.mxu1 %v3093_v50 }
 0x144   :  { %2663 = vmatprep.subr.bf16.mxu1 %v3094_v53 }
 0x146   :  { %2642 = vmatpush3.bf16.msra.mxu0 %v3079_v44 }
 0x147   :  { %2643 = vmatprep.subr.bf16.mxu0 %v3080_v46  ;;  %2664 = vmatpush3.bf16.msra.mxu1 %v3095_v55 }
 0x148   :  { %2665 = vmatprep.subr.bf16.mxu1 %v3096_v3 }
 0x14a   :  { %2644 = vmatpush3.bf16.msra.mxu0 %v3081_v48 }
 0x14b   :  { %2645 = vmatprep.subr.bf16.mxu0 %v3082_v51  ;;  %2666 = vmatpush3.bf16.msra.mxu1 %v3097_v5 }
 0x14c   :  { %2667 = vmatprep.subr.bf16.mxu1 %v3098_v14 }
 0x14e   :  { %2646 = vmatpush3.bf16.msra.mxu0 %v3083_v54 }
 0x14f   :  { %2647 = vmatprep.subr.bf16.mxu0 %v3084_v56  ;;  %2668 = vmatpush3.bf16.msra.mxu1 %v3099_v17 }
 0x150   :  { %2669 = vmatprep.subr.bf16.mxu1 %v3100_v26 }
 0x152   :  { %2648 = vmatpush3.bf16.msra.mxu0 %v3085_v57 }
 0x153   :  { %2670 = vmatpush3.bf16.msra.mxu1 %v3101_v28 }
 0x175   :  { %v1763_v6 = vpop.f32.mrf.mxu0 }
 0x176   :  { %v1804_v7 = vpop.f32.mrf.mxu1  ;;  %v1764_v11 = vadd.f32 %v1763_v6, %v1723_v4 }
 0x177   :  { %v1765_v12 = vpop.f32.mrf.mxu0 }
 0x178   :  { %v1806_v13 = vpop.f32.mrf.mxu1  ;;  %v1805_v15 = vadd.f32 %v1804_v7, %v1764_v11  ;;  %v1766_v16 = vadd.f32 %v1765_v12, %v1725_v10 }
 0x179   :  { %v1767_v18 = vpop.f32.mrf.mxu0 }
 0x17a   :  { %v1808_v19 = vpop.f32.mrf.mxu1  ;;  %v1807_v22 = vadd.f32 %v1806_v13, %v1766_v16  ;;  %v1975_v23 = vmax.f32 %v1805_v15, 0.0 }
 0x17b   :  { %v1768_v24 = vpop.f32.mrf.mxu0 }
 0x17c   :  { %v1809_v25 = vpop.f32.mrf.mxu1  ;;  %v1976_v27 = vmax.f32 %v1807_v22, 0.0  ;;  %v1979_v30 = vpack.c.bf16 %v1975_v23, %v1975_v23 }
 0x17e   :  { %v1980_v29 = vpack.c.bf16 %v1976_v27, %v1976_v27 }
 0x180   :  { %2278 = vmatprep.mubr.bf16.mxu0 %v1980_v29 }
 0x181   :  { %2279 = vmatmul.mubr.bf16.vlgmr.msra.gmra.mxu0 %v1979_v30 }
 0x1b5   :  { %v1845_v31 = vpop.f32.mrf.mxu0 }
 0x1b6   :  { %v1886_v32 = vpop.f32.mrf.mxu1  ;;  %v1846_v41 = vadd.f32 %v1845_v31, %v358_v49 }
 0x1b7   :  { %v1847_v33 = vpop.f32.mrf.mxu0 }
 0x1b8   :  { %v1888_v34 = vpop.f32.mrf.mxu1  ;;  %v1848_v37 = vadd.f32 %v1847_v33, %v362_v52  ;;  %v1887_v20 = vadd.f32 %v1886_v32, %v1846_v41 }
 0x1b9   :  { %v1849_v35 = vpop.f32.mrf.mxu0 }
 0x1ba   :  { %v1890_v36 = vpop.f32.mrf.mxu1  ;;  %v1889_v42 = vadd.f32 %v1888_v34, %v1848_v37 }
 0x1bb   :  { %v1850_v38 = vpop.f32.mrf.mxu0 }
 0x1bc   :  { %v1891_v39 = vpop.f32.mrf.mxu1 }
 0x1f5   :  { %v1927_v21 = vpop.f32.mrf.mxu0 }
 0x1f6   :  { %v1968_v40 = vpop.f32.mrf.mxu1  ;;  %v1928_v43 = vadd.f32 %v1927_v21, %v1887_v20 }
 0x1f7   :  { %v1929_v44 = vpop.f32.mrf.mxu0 }
 0x1f8   :  { %v1970_v45 = vpop.f32.mrf.mxu1  ;;  %v1969_v46 = vadd.f32 %v1968_v40, %v1928_v43  ;;  %v1930_v47 = vadd.f32 %v1929_v44, %v1889_v42 }
 0x1f9   :  { %v1931_v48 = vpop.f32.mrf.mxu0 }
 0x1fa   :  { %v1972_v50 = vpop.f32.mrf.mxu1  ;;  %v1971_v51 = vadd.f32 %v1970_v45, %v1930_v47  ;;  %v1977_v53 = vmax.f32 %v1969_v46, 0.0 }
 0x1fb   :  { %v1932_v54 = vpop.f32.mrf.mxu0 }
 0x1fc   :  { %v1973_v55 = vpop.f32.mrf.mxu1  ;;  %v1978_v56 = vmax.f32 %v1971_v51, 0.0  ;;  %v1981_v58 = vpack.c.bf16 %v1977_v53, %v1977_v53 }
 0x1fe   :  { %v1982_v57 = vpack.c.bf16 %v1978_v56, %v1978_v56 }
 0x200   :  { %2318 = vmatprep.mubr.bf16.mxu1 %v1982_v57 }
 0x201   :  { %2319 = vmatmul.mubr.bf16.vlgmr.msra.gmra.mxu1 %v1981_v58 }
 0x241   :  { %v2649_v59 = vpop.f32.mrf.mxu0 }
 0x243   :  { %v2650_v60 = vpop.f32.mrf.mxu0 }
 0x244   :  { %v2651_v61 = vadd.f32 %v2650_v60, %v2649_v59 }
 0x245   :  { %v2652_v62 = vpop.f32.mrf.mxu0 }
 0x246   :  { %v2281_v3 = vadd.f32 %v2651_v61, %v2600_v0 }
 0x247   :  { %v2653_v63 = vpop.f32.mrf.mxu0 }
 0x2c1   :  { %v2671_v1 = vpop.f32.mrf.mxu1 }
 0x2c3   :  { %v2672_v2 = vpop.f32.mrf.mxu1 }
 0x2c4   :  { %v2673_v4 = vadd.f32 %v2672_v2, %v2671_v1 }
 0x2c5   :  { %v2674_v5 = vpop.f32.mrf.mxu1 }
 0x2c6   :  { %v2321_v6 = vadd.f32 %v2673_v4, %v2281_v3 }
 0x2c7   :  { %v2675_v7 = vpop.f32.mrf.mxu1 }
 0x2c8   :  { %2326 = vst [vmem:[#allocation10] sm:$0xff] %v2321_v6 }
 0x2c9   :  { %3193 = shalt.err (!%p3190_p10)
}
 0x2ca   :  { %2336 = dma.vmem_to_hbm [thread:$0]  %s2334_s16, 128, %s3313_s5, [#allocation4]  }
 0x2cb   :  { %3208 = dma.done.wait [#allocation4], 128  }
 0x2cc   :  { %3209 = vsyncadd [#allocation4], 4294967168 }
 0x2cd   :  { %2340 = vsyncpa [#allocation3], 1 }
 0x2ce   :  { %2341 = vsyncpa [#allocation6], 1 }
 0x2cf   :  { %2342 = vsyncpa [#allocation9], 1 }
 0x2d0   :  { %2343 = vsyncpa [#allocation4], 1 }

</bundles_post_ra>
